<compile_context>
chip_gen: v5e
topology: v5e:2x2
jax: 0.10.0
libtpu: 0.0.40
codegen_flags: <defaults>
</compile_context>

<pallas_src>
import functools
import math

import jax
import jax.numpy as jnp
from jax.experimental import pallas as pl
from jax.experimental.pallas import tpu as pltpu

LANE = 128        # TPU lane width (last dim of a vreg)
BATCH_TILE = 128  # batch block when using the gridded (megacore) path


def mlp_kernel(x_ref, w_ref, b_ref, o_ref, *, num_layers):
    """Whole MLP (all layers) in one invocation.

    x_ref : (Bt, Hp)     input activations (lane-dense, zero padded)
    w_ref : (L, Hp, Hp)  all layer weights, already [in, out]
    b_ref : (L, 1, Hp)   all layer biases as rows
    o_ref : (Bt, Hp)     final (un-activated) layer output
    """
    h = x_ref[...].astype(jnp.float32)

    # Hidden layers: x @ W_l + b_l followed by tanh. Static loop -> fully
    # unrolled; activation stays in vregs across layers.
    for l in range(num_layers - 1):
        pre = (
            jnp.dot(h, w_ref[l], preferred_element_type=jnp.float32)
            + b_ref[l]
        )
        h = jnp.tanh(pre)

    # Last layer: no activation, single lane-dense store of the result.
    last = num_layers - 1
    out = (
        jnp.dot(h, w_ref[last], preferred_element_type=jnp.float32)
        + b_ref[last]
    )
    o_ref[...] = out.astype(o_ref.dtype)


@jax.jit
def mlp_forward(x, weights, biases):
    """x: (B, H) f32; weights: (L, H, H) in [in, out] layout; biases: (L, H)."""
    B, H = x.shape
    L = weights.shape[0]

    # Lane-dense padding: H -> multiple of 128.
    Hp = pl.cdiv(H, LANE) * LANE
    ph = Hp - H
    xp = jnp.pad(x, ((0, 0), (0, ph)))
    wp = jnp.pad(weights, ((0, 0), (0, ph), (0, ph)))
    bp = jnp.pad(biases, ((0, 0), (0, ph))).reshape(L, 1, Hp)

    kernel = functools.partial(mlp_kernel, num_layers=L)

    if B >= BATCH_TILE:
        # Large batch: shard the batch over a parallel grid axis so both v7x
        # TensorCores get work; weights/biases use a constant index_map and
        # stay VMEM-resident across grid steps.
        Bp = pl.cdiv(B, BATCH_TILE) * BATCH_TILE
        xp = jnp.pad(xp, ((0, Bp - B), (0, 0)))
        out = pl.pallas_call(
            kernel,
            out_shape=jax.ShapeDtypeStruct((Bp, Hp), x.dtype),
            grid=(Bp // BATCH_TILE,),
            in_specs=[
                pl.BlockSpec((BATCH_TILE, Hp), lambda i: (i, 0)),
                pl.BlockSpec((L, Hp, Hp), lambda i: (0, 0, 0)),
                pl.BlockSpec((L, 1, Hp), lambda i: (0, 0, 0)),
            ],
            out_specs=pl.BlockSpec((BATCH_TILE, Hp), lambda i: (i, 0)),
            compiler_params=pltpu.CompilerParams(
                dimension_semantics=("parallel",)
            ),
        )(xp, wp, bp)
    else:
        # Small batch: single invocation (grid=()); every operand is a full
        # VMEM-resident block — no per-step overhead, nothing to pipeline.
        out = pl.pallas_call(
            kernel,
            out_shape=jax.ShapeDtypeStruct((B, Hp), x.dtype),
            in_specs=[
                pl.BlockSpec(memory_space=pltpu.MemorySpace.VMEM),  # x
                pl.BlockSpec(memory_space=pltpu.MemorySpace.VMEM),  # weights
                pl.BlockSpec(memory_space=pltpu.MemorySpace.VMEM),  # biases
            ],
            out_specs=pl.BlockSpec(memory_space=pltpu.MemorySpace.VMEM),
        )(xp, wp, bp)

    return out[:B, :H]


def mlp_reference(x, weights, biases):
    """Pure-JAX reference mirroring the PyTorch forward."""
    L = weights.shape[0]
    h = x
    for l in range(L - 1):
        h = jnp.tanh(h @ weights[l] + biases[l])
    return h @ weights[L - 1] + biases[L - 1]


if __name__ == "__main__":
    # Module hyperparameters (small, consistent with the PyTorch __init__).
    hidd_layer_size = 32
    num_layers = 4
    sigma_w = 1.5
    sigma_b = 0.1
    batch = 8
    # act = tanh (constructor arg in PyTorch; baked into the kernel between
    # hidden layers).

    key = jax.random.PRNGKey(0)
    kx, kw, kb = jax.random.split(key, 3)

    # Deterministic parameter init matching nn.init.normal_ semantics:
    #   weight ~ N(0, sigma_w / sqrt(H)),  bias ~ N(0, sigma_b)
    # PyTorch Linear weight is [out, in]; generate [out, in] then transpose to
    # [in, out] so the kernel computes x @ W directly.
    w_oi = (
        jax.random.normal(
            kw, (num_layers, hidd_layer_size, hidd_layer_size), jnp.float32
        )
        * (sigma_w / math.sqrt(hidd_layer_size))
    )
    weights = jnp.transpose(w_oi, (0, 2, 1))  # [L, in, out]
    biases = (
        jax.random.normal(kb, (num_layers, hidd_layer_size), jnp.float32) * sigma_b
    )

    # --- Small-batch path (grid=(), everything VMEM resident) ---
    x = jax.random.normal(kx, (batch, hidd_layer_size), jnp.float32)
    out = jax.block_until_ready(mlp_forward(x, weights, biases))
    ref = mlp_reference(x, weights, biases)
    assert out.shape == (batch, hidd_layer_size)
    assert jnp.allclose(out, ref, atol=1e-4, rtol=1e-4)

    # --- Large-batch path (batch grid, parallel over TensorCores) ---
    x_big = jax.random.normal(kx, (256, hidd_layer_size), jnp.float32)
    out_big = jax.block_until_ready(mlp_forward(x_big, weights, biases))
    ref_big = mlp_reference(x_big, weights, biases)
    assert out_big.shape == (256, hidd_layer_size)
    assert jnp.allclose(out_big, ref_big, atol=1e-4, rtol=1e-4)

    # TODO(synk): pre_activations / retain_grad bookkeeping is autograd-side
    # state in PyTorch and has no forward-pass Pallas equivalent.
    print("KERNEL_OK")
</pallas_src>

<mosaic_0001>
module attributes {stable_mosaic.version = 11 : i64} {
  func.func @mlp_kernel(%arg0: memref<8x128xf32, #tpu.memory_space<vmem>>, %arg1: memref<4x128x128xf32, #tpu.memory_space<vmem>>, %arg2: memref<4x1x128xf32, #tpu.memory_space<vmem>>, %arg3: memref<8x128xf32, #tpu.memory_space<vmem>>) attributes {dimension_semantics = [], scalar_prefetch = 0 : i64, scratch_operands = 0 : i64, tpu.core_type = #tpu.core_type<tc>} {
    %c0 = arith.constant 0 : index
    %c0_0 = arith.constant 0 : index
    %0 = vector.load %arg0[%c0, %c0_0] : memref<8x128xf32, #tpu.memory_space<vmem>>, vector<8x128xf32>
    %c0_1 = arith.constant 0 : index
    %c0_2 = arith.constant 0 : index
    %c0_3 = arith.constant 0 : index
    %1 = vector.load %arg1[%c0_1, %c0_2, %c0_3] : memref<4x128x128xf32, #tpu.memory_space<vmem>>, vector<1x128x128xf32>
    %2 = vector.shape_cast %1 : vector<1x128x128xf32> to vector<128x128xf32>
    %cst = arith.constant dense<0.000000e+00> : vector<8x128xf32>
    %3 = tpu.matmul %0, %2, %cst {dimension_numbers = #tpu.dot_dimension_numbers<[1], [0], [0], [1], [0, 0, 1, 1], [], []>} : vector<8x128xf32>, vector<128x128xf32>, vector<8x128xf32> -> vector<8x128xf32>
    %c0_4 = arith.constant 0 : index
    %c0_5 = arith.constant 0 : index
    %c0_6 = arith.constant 0 : index
    %4 = vector.load %arg2[%c0_4, %c0_5, %c0_6] : memref<4x1x128xf32, #tpu.memory_space<vmem>>, vector<1x1x128xf32>
    %5 = vector.shape_cast %4 : vector<1x1x128xf32> to vector<1x128xf32>
    %6 = vector.broadcast %5 : vector<1x128xf32> to vector<8x128xf32>
    %7 = arith.addf %3, %6 : vector<8x128xf32>
    %8 = math.tanh %7 : vector<8x128xf32>
    %c1 = arith.constant 1 : index
    %c0_7 = arith.constant 0 : index
    %c0_8 = arith.constant 0 : index
    %9 = vector.load %arg1[%c1, %c0_7, %c0_8] : memref<4x128x128xf32, #tpu.memory_space<vmem>>, vector<1x128x128xf32>
    %10 = vector.shape_cast %9 : vector<1x128x128xf32> to vector<128x128xf32>
    %cst_9 = arith.constant dense<0.000000e+00> : vector<8x128xf32>
    %11 = tpu.matmul %8, %10, %cst_9 {dimension_numbers = #tpu.dot_dimension_numbers<[1], [0], [0], [1], [0, 0, 1, 1], [], []>} : vector<8x128xf32>, vector<128x128xf32>, vector<8x128xf32> -> vector<8x128xf32>
    %c1_10 = arith.constant 1 : index
    %c0_11 = arith.constant 0 : index
    %c0_12 = arith.constant 0 : index
    %12 = vector.load %arg2[%c1_10, %c0_11, %c0_12] : memref<4x1x128xf32, #tpu.memory_space<vmem>>, vector<1x1x128xf32>
    %13 = vector.shape_cast %12 : vector<1x1x128xf32> to vector<1x128xf32>
    %14 = vector.broadcast %13 : vector<1x128xf32> to vector<8x128xf32>
    %15 = arith.addf %11, %14 : vector<8x128xf32>
    %16 = math.tanh %15 : vector<8x128xf32>
    %c2 = arith.constant 2 : index
    %c0_13 = arith.constant 0 : index
    %c0_14 = arith.constant 0 : index
    %17 = vector.load %arg1[%c2, %c0_13, %c0_14] : memref<4x128x128xf32, #tpu.memory_space<vmem>>, vector<1x128x128xf32>
    %18 = vector.shape_cast %17 : vector<1x128x128xf32> to vector<128x128xf32>
    %cst_15 = arith.constant dense<0.000000e+00> : vector<8x128xf32>
    %19 = tpu.matmul %16, %18, %cst_15 {dimension_numbers = #tpu.dot_dimension_numbers<[1], [0], [0], [1], [0, 0, 1, 1], [], []>} : vector<8x128xf32>, vector<128x128xf32>, vector<8x128xf32> -> vector<8x128xf32>
    %c2_16 = arith.constant 2 : index
    %c0_17 = arith.constant 0 : index
    %c0_18 = arith.constant 0 : index
    %20 = vector.load %arg2[%c2_16, %c0_17, %c0_18] : memref<4x1x128xf32, #tpu.memory_space<vmem>>, vector<1x1x128xf32>
    %21 = vector.shape_cast %20 : vector<1x1x128xf32> to vector<1x128xf32>
    %22 = vector.broadcast %21 : vector<1x128xf32> to vector<8x128xf32>
    %23 = arith.addf %19, %22 : vector<8x128xf32>
    %24 = math.tanh %23 : vector<8x128xf32>
    %c3 = arith.constant 3 : index
    %c0_19 = arith.constant 0 : index
    %c0_20 = arith.constant 0 : index
    %25 = vector.load %arg1[%c3, %c0_19, %c0_20] : memref<4x128x128xf32, #tpu.memory_space<vmem>>, vector<1x128x128xf32>
    %26 = vector.shape_cast %25 : vector<1x128x128xf32> to vector<128x128xf32>
    %cst_21 = arith.constant dense<0.000000e+00> : vector<8x128xf32>
    %27 = tpu.matmul %24, %26, %cst_21 {dimension_numbers = #tpu.dot_dimension_numbers<[1], [0], [0], [1], [0, 0, 1, 1], [], []>} : vector<8x128xf32>, vector<128x128xf32>, vector<8x128xf32> -> vector<8x128xf32>
    %c3_22 = arith.constant 3 : index
    %c0_23 = arith.constant 0 : index
    %c0_24 = arith.constant 0 : index
    %28 = vector.load %arg2[%c3_22, %c0_23, %c0_24] : memref<4x1x128xf32, #tpu.memory_space<vmem>>, vector<1x1x128xf32>
    %29 = vector.shape_cast %28 : vector<1x1x128xf32> to vector<1x128xf32>
    %30 = vector.broadcast %29 : vector<1x128xf32> to vector<8x128xf32>
    %31 = arith.addf %27, %30 : vector<8x128xf32>
    %c0_25 = arith.constant 0 : index
    %c0_26 = arith.constant 0 : index
    %32 = vector.load %arg3[%c0_25, %c0_26] : memref<8x128xf32, #tpu.memory_space<vmem>>, vector<8x128xf32>
    tpu.vector_store %arg3[%c0_25, %c0_26], %31 {strides = array<i32>} : memref<8x128xf32, #tpu.memory_space<vmem>>, vector<8x128xf32>,
    return
  }
}

</mosaic_0001>

<bundles_post_ra>
// kernel: mlp_forward.1
= control target key start
LH: loop header
LB: loop body
LE: loop exit
PB: predicated region body
PF: predicated region fallthrough
CT: control target
= control target key end

     0   :  { %s521_s0 = inlined_call_operand.vmem [shape: f32[8,128], index: 0, kind: input, shape index: {}]   ;;  %s522_s1 = inlined_call_operand.vmem [shape: f32[4,128,128], index: 1, kind: input, shape index: {}]   ;;  %s523_s2 = inlined_call_operand.vmem [shape: f32[4,1,128], index: 2, kind: input, shape index: {}]   ;;  %s524_s3 = inlined_call_operand.hbm [shape: f32[8,128], index: 3, kind: output, shape index: {}]  }
   0x1   :  { %v31_v0 = vld [vmem:[%s522_s1 + $0x78] sm:$0xff]  ;;  %v30_v1 = vld [vmem:[%s522_s1 + $0x70] sm:$0xff]  ;;  %v29_v2 = vld [vmem:[%s522_s1 + $0x68] sm:$0xff] }
   0x2   :  { %36 = vmatpush.msra.mxu0 %v31_v0  ;;  %v28_v3 = vld [vmem:[%s522_s1 + $0x60] sm:$0xff]  ;;  %v217_v4 = vld [vmem:[%s522_s1 + $0xf8] sm:$0xff]  ;;  %v216_v6 = vld [vmem:[%s522_s1 + $0xf0] sm:$0xff] }
   0x3   :  { %v27_v5 = vld [vmem:[%s522_s1 + $0x58] sm:$0xff]  ;;  %79 = vmatpush.msra.mxu1 %v217_v4  ;;  %v215_v7 = vld [vmem:[%s522_s1 + $0xe8] sm:$0xff]  ;;  %v26_v8 = vld [vmem:[%s522_s1 + $0x50] sm:$0xff] }
   0x4   :  { %37 = vmatpush.msra.mxu0 %v30_v1  ;;  %v25_v9 = vld [vmem:[%s522_s1 + $0x48] sm:$0xff]  ;;  %v214_v10 = vld [vmem:[%s522_s1 + $0xe0] sm:$0xff]  ;;  %v213_v11 = vld [vmem:[%s522_s1 + $0xd8] sm:$0xff] }
   0x5   :  { %80 = vmatpush.msra.mxu1 %v216_v6 }
   0x6   :  { %38 = vmatpush.msra.mxu0 %v29_v2 }
   0x7   :  { %81 = vmatpush.msra.mxu1 %v215_v7 }
   0x8   :  { %39 = vmatpush.msra.mxu0 %v28_v3 }
   0xa   :  { %40 = vmatpush.msra.mxu0 %v27_v5 }
   0xc   :  { %41 = vmatpush.msra.mxu0 %v26_v8 }
   0xd   :  { %8 = vsyncpa [#allocation3], 0  ;;  %v24_v12 = vld [vmem:[%s522_s1 + $0x40] sm:$0xff]  ;;  %82 = vmatpush.msra.mxu1 %v214_v10  ;;  %v212_v13 = vld [vmem:[%s522_s1 + $0xd0] sm:$0xff]  ;;  %s290_s12 = smov [#allocation2]  }
   0xe   :  { %42 = vmatpush.msra.mxu0 %v25_v9  ;;  %v23_v14 = vld [vmem:[%s522_s1 + $0x38] sm:$0xff]  ;;  %v211_v15 = vld [vmem:[%s522_s1 + $0xc8] sm:$0xff]  ;;  %v22_v16 = vld [vmem:[%s522_s1 + $0x30] sm:$0xff]  ;;  %s191_s13 = sshll.u32 %s290_s12, 4  ;;  %s192_s13 = int_to_ptr.vmem [resolvable:$true] %s191_s13 }
   0xf   :  { %83 = vmatpush.msra.mxu1 %v213_v11  ;;  %v210_v17 = vld [vmem:[%s522_s1 + $0xc0] sm:$0xff]  ;;  %v21_v18 = vld [vmem:[%s522_s1 + $0x28] sm:$0xff]  ;;  %v209_v19 = vld [vmem:[%s522_s1 + $0xb8] sm:$0xff] }
  0x10   :  { %43 = vmatpush.msra.mxu0 %v24_v12  ;;  %v20_v20 = vld [vmem:[%s522_s1 + $0x20] sm:$0xff]  ;;  %v208_v21 = vld [vmem:[%s522_s1 + $0xb0] sm:$0xff]  ;;  %v19_v22 = vld [vmem:[%s522_s1 + $0x18] sm:$0xff] }
  0x11   :  { %84 = vmatpush.msra.mxu1 %v212_v13  ;;  %v207_v23 = vld [vmem:[%s522_s1 + $0xa8] sm:$0xff]  ;;  %v18_v24 = vld [vmem:[%s522_s1 + $0x10] sm:$0xff]  ;;  %v16_v26 = vld [vmem:[%s522_s1] sm:$0xff] }
  0x12   :  { %44 = vmatpush.msra.mxu0 %v23_v14  ;;  %v17_v25 = vld [vmem:[%s522_s1 + $0x8] sm:$0xff]  ;;  %v15_v27 = vld [vmem:[%s521_s0] sm:$0xff]  ;;  %v205_v29 = vld [vmem:[%s522_s1 + $0x98] sm:$0xff] }
  0x13   :  { %85 = vmatpush.msra.mxu1 %v211_v15  ;;  %v206_v28 = vld [vmem:[%s522_s1 + $0xa0] sm:$0xff]  ;;  %v204_v30 = vld [vmem:[%s522_s1 + $0x90] sm:$0xff]  ;;  %v203_v31 = vld [vmem:[%s522_s1 + $0x88] sm:$0xff] }
  0x14   :  { %45 = vmatpush.msra.mxu0 %v22_v16  ;;  %v202_v32 = vld [vmem:[%s522_s1 + $0x80] sm:$0xff]  ;;  %v234_v33 = vld [vmem:[%s522_s1 + $0x178] sm:$0xff]  ;;  %v233_v34 = vld [vmem:[%s522_s1 + $0x170] sm:$0xff] }
  0x15   :  { %86 = vmatpush.msra.mxu1 %v210_v17  ;;  %122 = vmatpush.msra.mxu2 %v234_v33  ;;  %v232_v35 = vld [vmem:[%s522_s1 + $0x168] sm:$0xff]  ;;  %v231_v36 = vld [vmem:[%s522_s1 + $0x160] sm:$0xff]  ;;  %v230_v37 = vld [vmem:[%s522_s1 + $0x158] sm:$0xff] }
  0x16   :  { %46 = vmatpush.msra.mxu0 %v21_v18  ;;  %v229_v38 = vld [vmem:[%s522_s1 + $0x150] sm:$0xff]  ;;  %v228_v39 = vld [vmem:[%s522_s1 + $0x148] sm:$0xff]  ;;  %v227_v40 = vld [vmem:[%s522_s1 + $0x140] sm:$0xff] }
  0x17   :  { %87 = vmatpush.msra.mxu1 %v209_v19  ;;  %123 = vmatpush.msra.mxu2 %v233_v34  ;;  %v226_v41 = vld [vmem:[%s522_s1 + $0x138] sm:$0xff]  ;;  %v225_v42 = vld [vmem:[%s522_s1 + $0x130] sm:$0xff]  ;;  %v224_v43 = vld [vmem:[%s522_s1 + $0x128] sm:$0xff] }
  0x18   :  { %47 = vmatpush.msra.mxu0 %v20_v20  ;;  %v254_v44 = vld [vmem:[%s523_s2] ss:$0 sm:$0xff]  ;;  %v222_v49 = vld [vmem:[%s522_s1 + $0x118] sm:$0xff]  ;;  %v221_v50 = vld [vmem:[%s522_s1 + $0x110] sm:$0xff] }
  0x19   :  { %88 = vmatpush.msra.mxu1 %v208_v21  ;;  %124 = vmatpush.msra.mxu2 %v232_v35  ;;  %v223_v48 = vld [vmem:[%s522_s1 + $0x120] sm:$0xff]  ;;  %v220_v51 = vld [vmem:[%s522_s1 + $0x108] sm:$0xff]  ;;  %v251_v53 = vld [vmem:[%s522_s1 + $0x1f8] sm:$0xff] }
  0x1a   :  { %48 = vmatpush.msra.mxu0 %v19_v22  ;;  %v219_v52 = vld [vmem:[%s522_s1 + $0x100] sm:$0xff]  ;;  %v250_v54 = vld [vmem:[%s522_s1 + $0x1f0] sm:$0xff]  ;;  %165 = vmatpush.msra.mxu3 %v251_v53  ;;  %v249_v55 = vld [vmem:[%s522_s1 + $0x1e8] sm:$0xff] }
  0x1b   :  { %89 = vmatpush.msra.mxu1 %v207_v23  ;;  %125 = vmatpush.msra.mxu2 %v231_v36  ;;  %v248_v56 = vld [vmem:[%s522_s1 + $0x1e0] sm:$0xff]  ;;  %v247_v57 = vld [vmem:[%s522_s1 + $0x1d8] sm:$0xff]  ;;  %v246_v58 = vld [vmem:[%s522_s1 + $0x1d0] sm:$0xff] }
  0x1c   :  { %49 = vmatpush.msra.mxu0 %v18_v24  ;;  %166 = vmatpush.msra.mxu3 %v250_v54  ;;  %v245_v59 = vld [vmem:[%s522_s1 + $0x1c8] sm:$0xff]  ;;  %v244_v60 = vld [vmem:[%s522_s1 + $0x1c0] sm:$0xff]  ;;  %v243_v61 = vld [vmem:[%s522_s1 + $0x1b8] sm:$0xff] }
  0x1d   :  { %90 = vmatpush.msra.mxu1 %v206_v28  ;;  %126 = vmatpush.msra.mxu2 %v230_v37  ;;  %v242_v62 = vld [vmem:[%s522_s1 + $0x1b0] sm:$0xff]  ;;  %v241_v63 = vld [vmem:[%s522_s1 + $0x1a8] sm:$0xff]  ;;  %v255_v0 = vld [vmem:[%s523_s2 + $0x1] ss:$0 sm:$0xff] }
  0x1e   :  { %50 = vmatpush.msra.mxu0 %v17_v25  ;;  %167 = vmatpush.msra.mxu3 %v249_v55  ;;  %v240_v4 = vld [vmem:[%s522_s1 + $0x1a0] sm:$0xff]  ;;  %v239_v5 = vld [vmem:[%s522_s1 + $0x198] sm:$0xff]  ;;  %v238_v6 = vld [vmem:[%s522_s1 + $0x190] sm:$0xff] }
  0x1f   :  { %91 = vmatpush.msra.mxu1 %v205_v29  ;;  %127 = vmatpush.msra.mxu2 %v229_v38  ;;  %v237_v7 = vld [vmem:[%s522_s1 + $0x188] sm:$0xff]  ;;  %v236_v8 = vld [vmem:[%s522_s1 + $0x180] sm:$0xff]  ;;  %s193_s1 = sshll.u32 %s524_s3, 4  ;;  %s194_s1 = int_to_ptr.hbm [resolvable:$true] %s193_s1 }
  0x20   :  { %51 = vmatpush.msra.mxu0 %v16_v26  ;;  %168 = vmatpush.msra.mxu3 %v248_v56  ;;  %v256_v9 = vld [vmem:[%s523_s2 + $0x2] ss:$0 sm:$0xff]  ;;  %v257_v13 = vld [vmem:[%s523_s2 + $0x3] ss:$0 sm:$0xff] }
  0x21   :  { %52 = vmatmul.f32.vlgmr.msra.gmra.mxu0 %v15_v27  ;;  %92 = vmatpush.msra.mxu1 %v204_v30 }
  0x22   :  { %128 = vmatpush.msra.mxu2 %v228_v39  ;;  %169 = vmatpush.msra.mxu3 %v247_v57 }
  0x23   :  { %93 = vmatpush.msra.mxu1 %v203_v31 }
  0x24   :  { %129 = vmatpush.msra.mxu2 %v227_v40  ;;  %170 = vmatpush.msra.mxu3 %v246_v58 }
  0x25   :  { %94 = vmatpush.msra.mxu1 %v202_v32 }
  0x26   :  { %130 = vmatpush.msra.mxu2 %v226_v41  ;;  %171 = vmatpush.msra.mxu3 %v245_v59 }
  0x28   :  { %131 = vmatpush.msra.mxu2 %v225_v42  ;;  %172 = vmatpush.msra.mxu3 %v244_v60 }
  0x2a   :  { %132 = vmatpush.msra.mxu2 %v224_v43  ;;  %173 = vmatpush.msra.mxu3 %v243_v61 }
  0x2c   :  { %133 = vmatpush.msra.mxu2 %v223_v48  ;;  %174 = vmatpush.msra.mxu3 %v242_v62 }
  0x2e   :  { %134 = vmatpush.msra.mxu2 %v222_v49  ;;  %175 = vmatpush.msra.mxu3 %v241_v63 }
  0x30   :  { %135 = vmatpush.msra.mxu2 %v221_v50  ;;  %176 = vmatpush.msra.mxu3 %v240_v4 }
  0x32   :  { %136 = vmatpush.msra.mxu2 %v220_v51  ;;  %177 = vmatpush.msra.mxu3 %v239_v5 }
  0x34   :  { %137 = vmatpush.msra.mxu2 %v219_v52  ;;  %178 = vmatpush.msra.mxu3 %v238_v6 }
  0x36   :  { %179 = vmatpush.msra.mxu3 %v237_v7 }
  0x38   :  { %180 = vmatpush.msra.mxu3 %v236_v8 }
  0x9e   :  { %v53_v45 = vpop.f32.mrf.mxu0 }
  0x9f   :  { %v54_v46 = vadd.f32 %v254_v44, %v53_v45 }
  0xa1   :  { %258 = vtanh.f32 %v54_v46 }
  0xa7   :  { %v259_v47 = vpop.eup %258 }
  0xa8   :  { %95 = vmatmul.f32.vlgmr.msra.gmra.mxu1 %v259_v47 }
 0x125   :  { %v96_v1 = vpop.f32.mrf.mxu1 }
 0x126   :  { %v97_v2 = vadd.f32 %v255_v0, %v96_v1 }
 0x128   :  { %260 = vtanh.f32 %v97_v2 }
 0x12e   :  { %v261_v3 = vpop.eup %260 }
 0x12f   :  { %138 = vmatmul.f32.vlgmr.msra.gmra.mxu2 %v261_v3 }
 0x1b2   :  { %v139_v10 = vpop.f32.mrf.mxu2 }
 0x1b3   :  { %v140_v11 = vadd.f32 %v256_v9, %v139_v10 }
 0x1b5   :  { %262 = vtanh.f32 %v140_v11 }
 0x1bb   :  { %v263_v12 = vpop.eup %262 }
 0x1bc   :  { %181 = vmatmul.f32.vlgmr.msra.gmra.mxu3 %v263_v12 }
 0x23f   :  { %v182_v14 = vpop.f32.mrf.mxu3 }
 0x240   :  { %v183_v15 = vadd.f32 %v257_v13, %v182_v14 }
 0x242   :  { %185 = vst [vmem:[#allocation2] sm:$0xff] %v183_v15 }
 0x243   :  { %196 = dma.vmem_to_hbm [thread:$0]  %s192_s13, 128, %s194_s1, [#allocation3]  }
 0x244   :  { %288 = dma.done.wait [#allocation3], 128  }
 0x245   :  { %289 = vsyncadd [#allocation3], 4294967168 }
 0x246   :  { %201 = vsyncpa [#allocation3], 1 }

</bundles_post_ra>
